<compile_context>
chip_gen: v7x
topology: tpu7x:2x2x1
jax: 0.10.0
libtpu: 0.0.40
codegen_flags: <defaults>
</compile_context>

<pallas_src>
import jax
import jax.numpy as jnp
from jax.experimental import pallas as pl
from jax.experimental.pallas import tpu as pltpu


_VMEM_LIMIT = 32 * 1024 * 1024        # >= scoped default on v5e/v6e/v7x
_FUSED_STEP_BUDGET = 20 * 1024 * 1024  # per-grid-step VMEM target (headroom vs limit)


# --------------------------------------------------------------------------
# helpers
# --------------------------------------------------------------------------
def _round_up(x, m):
    return ((x + m - 1) // m) * m


def _pick_tile(dim, max_tile=512):
    """Pick a lane/MXU-friendly tile (multiple of 128, <= max_tile) and the
    padded dim.  Pads only to a 128 multiple unless a bigger tile costs <=10%
    extra area (avoids inflating work for awkward sizes like N=600)."""
    base = _round_up(dim, 128)
    if base <= max_tile:
        return base, base                      # single block, minimal padding
    for t in (max_tile, 256, 128):
        padded = _round_up(dim, t)
        if padded <= base + base // 10:
            return t, padded
    return 128, base                           # unreachable (t=128 always fits)


def _divisor_tiles(padded, start):
    """Descending 128-multiples <= start that divide `padded`."""
    out = []
    t = start
    while t >= 128:
        if padded % t == 0:
            out.append(t)
        t -= 128
    return out


def _fused_step_bytes(tm, tn, tk, kp, in_bytes, out_bytes):
    """Rough per-grid-step VMEM footprint of the fused kernel (double-buffered
    inputs + double-buffered output + f32 accumulator scratch)."""
    return (2 * (tm * tk + tk * kp + kp * tn + tn) * in_bytes
            + 2 * tm * tn * out_bytes
            + tm * tn * 4)


# --------------------------------------------------------------------------
# fused GCN kernels:  out[i, j] += adj[i, k] @ (x[k, :] @ w[:, j])  (+ bias)
# --------------------------------------------------------------------------
def _gcn_fused_kernel(adj_ref, x_ref, w_ref, bias_ref, o_ref, acc_ref):
    k = pl.program_id(2)

    @pl.when(k == 0)
    def _():
        acc_ref[...] = jnp.zeros_like(acc_ref)

    a = adj_ref[...]
    # support tile for this k-block, accumulated in f32 on the MXU.
    support = jnp.dot(x_ref[...], w_ref[...], preferred_element_type=jnp.float32)
    acc_ref[...] += jnp.dot(a, support.astype(a.dtype),
                            preferred_element_type=jnp.float32)

    @pl.when(k == pl.num_programs(2) - 1)
    def _():
        o_ref[...] = (acc_ref[...] + bias_ref[...]).astype(o_ref.dtype)


def _gcn_fused_1k_kernel(adj_ref, x_ref, w_ref, bias_ref, o_ref):
    """Single-k-block variant: no accumulator scratch, no init/epilogue passes."""
    a = adj_ref[...]
    support = jnp.dot(x_ref[...], w_ref[...], preferred_element_type=jnp.float32)
    out = jnp.dot(a, support.astype(a.dtype), preferred_element_type=jnp.float32)
    o_ref[...] = (out + bias_ref[...]).astype(o_ref.dtype)


# --------------------------------------------------------------------------
# generic tiled matmul (fallback path only): out = a @ b + bias_row
# --------------------------------------------------------------------------
def _mm_acc_kernel(a_ref, b_ref, bias_ref, o_ref, acc_ref):
    @pl.when(pl.program_id(2) == 0)
    def _():
        acc_ref[...] = jnp.zeros_like(acc_ref)

    acc_ref[...] += jnp.dot(a_ref[...], b_ref[...],
                            preferred_element_type=jnp.float32)

    @pl.when(pl.program_id(2) == pl.num_programs(2) - 1)
    def _():
        o_ref[...] = (acc_ref[...] + bias_ref[...]).astype(o_ref.dtype)


def _mm_1k_kernel(a_ref, b_ref, bias_ref, o_ref):
    out = jnp.dot(a_ref[...], b_ref[...], preferred_element_type=jnp.float32)
    o_ref[...] = (out + bias_ref[...]).astype(o_ref.dtype)


def _pallas_matmul(a, b, bias_row, *, tm, tn, tk, out_dtype):
    M, K = a.shape
    K2, N = b.shape
    assert K == K2 and M % tm == 0 and N % tn == 0 and K % tk == 0
    nk = K // tk

    if nk == 1:
        return pl.pallas_call(
            _mm_1k_kernel,
            out_shape=jax.ShapeDtypeStruct((M, N), out_dtype),
            grid_spec=pltpu.PrefetchScalarGridSpec(
                num_scalar_prefetch=0,
                grid=(M // tm, N // tn),
                in_specs=[
                    pl.BlockSpec((tm, K), lambda i, j: (i, 0)),
                    pl.BlockSpec((K, tn), lambda i, j: (0, j)),
                    pl.BlockSpec((1, tn), lambda i, j: (0, j)),
                ],
                out_specs=pl.BlockSpec((tm, tn), lambda i, j: (i, j)),
            ),
            compiler_params=pltpu.CompilerParams(
                dimension_semantics=("parallel", "parallel"),
                vmem_limit_bytes=_VMEM_LIMIT,
            ),
        )(a, b, bias_row)

    return pl.pallas_call(
        _mm_acc_kernel,
        out_shape=jax.ShapeDtypeStruct((M, N), out_dtype),
        grid_spec=pltpu.PrefetchScalarGridSpec(
            num_scalar_prefetch=0,
            grid=(M // tm, N // tn, nk),
            in_specs=[
                pl.BlockSpec((tm, tk), lambda i, j, k: (i, k)),
                pl.BlockSpec((tk, tn), lambda i, j, k: (k, j)),
                pl.BlockSpec((1, tn), lambda i, j, k: (0, j)),
            ],
            out_specs=pl.BlockSpec((tm, tn), lambda i, j, k: (i, j)),
            scratch_shapes=[pltpu.VMEM((tm, tn), jnp.float32)],
        ),
        compiler_params=pltpu.CompilerParams(
            dimension_semantics=("parallel", "parallel", "arbitrary"),
            vmem_limit_bytes=_VMEM_LIMIT,
        ),
    )(a, b, bias_row)


# --------------------------------------------------------------------------
# GraphConvolution forward
# --------------------------------------------------------------------------
def graph_convolution(x, adj, weight, bias=None, *, compute_dtype=None,
                      max_tile=512, force_two_pass=False):
    """Pallas implementation of GraphConvolution.forward(input, adj).

    compute_dtype=jnp.bfloat16 casts adj/x/w (accumulation stays f32) — this
    changes rounding vs the f32 PyTorch reference; leave None for parity.
    """
    N, in_f = x.shape
    in_f_w, out_f = weight.shape
    assert in_f_w == in_f and adj.shape == (N, N)
    out_dtype = x.dtype

    tN, Np = _pick_tile(N, max_tile)
    tK, Kp = _pick_tile(in_f, max_tile)
    tF, Fp = _pick_tile(out_f, max_tile)

    # Zero-pad to 128-aligned shapes; skip when already aligned so adj (the
    # only potentially large operand) is not copied in HBM.
    # TODO(synk): for very large unaligned graphs, mask the edge blocks
    # in-kernel instead of materializing a padded copy of adj.
    xp = x if (Np == N and Kp == in_f) else jnp.pad(x, ((0, Np - N), (0, Kp - in_f)))
    wp = (weight if (Kp == in_f and Fp == out_f)
          else jnp.pad(weight, ((0, Kp - in_f), (0, Fp - out_f))))
    adjp = adj if Np == N else jnp.pad(adj, ((0, Np - N), (0, Np - N)))
    if bias is not None:
        bp = jnp.pad(bias.astype(jnp.float32).reshape(1, -1),
                     ((0, 0), (0, Fp - out_f)))
    else:
        bp = jnp.zeros((1, Fp), jnp.float32)

    if compute_dtype is not None:
        xp = xp.astype(compute_dtype)
        wp = wp.astype(compute_dtype)
        adjp = adjp.astype(compute_dtype)

    in_bytes = jnp.dtype(xp.dtype).itemsize
    out_bytes = jnp.dtype(out_dtype).itemsize

    # ---- fused single-kernel path: pick the largest tiles that fit VMEM ----
    tm_f = tk_f = None
    if not force_two_pass:
        for tk_c in _divisor_tiles(Np, tN):
            for tm_c in _divisor_tiles(Np, tN):
                if _fused_step_bytes(tm_c, tF, tk_c, Kp,
                                     in_bytes, out_bytes) <= _FUSED_STEP_BUDGET:
                    tm_f, tk_f = tm_c, tk_c
                    break
            if tm_f is not None:
                break

    if tm_f is not None:
        ni, nj, nk = Np // tm_f, Fp // tF, Np // tk_f
        if nk == 1:
            out_p = pl.pallas_call(
                _gcn_fused_1k_kernel,
                out_shape=jax.ShapeDtypeStruct((Np, Fp), out_dtype),
                grid_spec=pltpu.PrefetchScalarGridSpec(
                    num_scalar_prefetch=0,
                    grid=(ni, nj),
                    in_specs=[
                        pl.BlockSpec((tm_f, Np), lambda i, j: (i, 0)),   # adj row panel
                        pl.BlockSpec((Np, Kp), lambda i, j: (0, 0)),     # x (resident)
                        pl.BlockSpec((Kp, tF), lambda i, j: (0, j)),     # w (resident)
                        pl.BlockSpec((1, tF), lambda i, j: (0, j)),      # bias
                    ],
                    out_specs=pl.BlockSpec((tm_f, tF), lambda i, j: (i, j)),
                ),
                compiler_params=pltpu.CompilerParams(
                    dimension_semantics=("parallel", "parallel"),
                    vmem_limit_bytes=_VMEM_LIMIT,
                ),
            )(adjp, xp, wp, bp)
        else:
            out_p = pl.pallas_call(
                _gcn_fused_kernel,
                out_shape=jax.ShapeDtypeStruct((Np, Fp), out_dtype),
                grid_spec=pltpu.PrefetchScalarGridSpec(
                    num_scalar_prefetch=0,
                    grid=(ni, nj, nk),
                    in_specs=[
                        pl.BlockSpec((tm_f, tk_f), lambda i, j, k: (i, k)),  # adj tile
                        pl.BlockSpec((tk_f, Kp), lambda i, j, k: (k, 0)),    # x k-panel
                        pl.BlockSpec((Kp, tF), lambda i, j, k: (0, j)),      # w (resident)
                        pl.BlockSpec((1, tF), lambda i, j, k: (0, j)),       # bias
                    ],
                    out_specs=pl.BlockSpec((tm_f, tF), lambda i, j, k: (i, j)),
                    scratch_shapes=[pltpu.VMEM((tm_f, tF), jnp.float32)],
                ),
                compiler_params=pltpu.CompilerParams(
                    # NOTE(v7x): if a profile shows one idle TensorCore (out_f
                    # small -> nj == 1), switch the leading axis to CORE_PARALLEL.
                    dimension_semantics=("parallel", "parallel", "arbitrary"),
                    vmem_limit_bytes=_VMEM_LIMIT,
                ),
            )(adjp, xp, wp, bp)
        return out_p[:N, :out_f]

    # ---- fallback: two tiled matmuls (very large in_f) ----
    support = _pallas_matmul(xp, wp, jnp.zeros((1, Fp), jnp.float32),
                             tm=tN, tn=tF, tk=tK, out_dtype=xp.dtype)
    out_p = _pallas_matmul(adjp, support, bp,
                           tm=tN, tn=tF, tk=tN, out_dtype=out_dtype)
    return out_p[:N, :out_f]


def init_gcn_params(key, in_features, out_features, bias=False):
    """Deterministic re-implementation of GraphConvolution.reset_parameters()."""
    stdv = 1.0 / (out_features ** 0.5)
    kw, kb = jax.random.split(key)
    weight = jax.random.uniform(
        kw, (in_features, out_features), jnp.float32, minval=-stdv, maxval=stdv
    )
    b = None
    if bias:
        b = jax.random.uniform(
            kb, (out_features,), jnp.float32, minval=-stdv, maxval=stdv
        )
    return weight, b


# --------------------------------------------------------------------------
# demo / self-test
# --------------------------------------------------------------------------
if __name__ == "__main__":
    key = jax.random.PRNGKey(0)
    keys = jax.random.split(key, 9)

    def make_adj(k, n):
        a = (jax.random.uniform(k, (n, n)) < 0.15).astype(jnp.float32)
        a = jnp.maximum(a, a.T) + jnp.eye(n, dtype=jnp.float32)
        return a / jnp.sum(a, axis=1, keepdims=True)

    # ---- case 1: small, aligned, bias=False (single-step fused kernel) -----
    N1, in1, out1 = 128, 64, 32
    x1 = jax.random.normal(keys[0], (N1, in1), jnp.float32)
    adj1 = make_adj(keys[1], N1)
    w1, b1 = init_gcn_params(keys[2], in1, out1, bias=False)

    o1 = graph_convolution(x1, adj1, w1, b1)
    jax.block_until_ready(o1)
    r1 = adj1 @ (x1 @ w1)
    assert o1.shape == (N1, out1)
    assert jnp.allclose(o1, r1, atol=2e-4, rtol=2e-4)

    # same case, bf16 operands (f32 accumulation) — looser tolerance
    o1b = graph_convolution(x1, adj1, w1, b1, compute_dtype=jnp.bfloat16)
    jax.block_until_ready(o1b)
    assert jnp.allclose(o1b, r1, atol=5e-2, rtol=5e-2)

    # ---- case 2: unaligned dims, bias=True (padding + fused 1k path) -------
    N2, in2, out2 = 200, 48, 96
    x2 = jax.random.normal(keys[3], (N2, in2), jnp.float32)
    adj2 = make_adj(keys[4], N2)
    w2, b2 = init_gcn_params(keys[5], in2, out2, bias=True)

    o2 = graph_convolution(x2, adj2, w2, b2)
    jax.block_until_ready(o2)
    r2 = adj2 @ (x2 @ w2) + b2
    assert o2.shape == (N2, out2)
    assert jnp.allclose(o2, r2, atol=2e-4, rtol=2e-4)

    # exercise the two-pass fallback path on the same problem
    o2f = graph_convolution(x2, adj2, w2, b2, force_two_pass=True)
    jax.block_until_ready(o2f)
    assert jnp.allclose(o2f, r2, atol=2e-4, rtol=2e-4)

    # ---- case 3: multi-k-block reduction (accumulator kernel) --------------
    N3, in3, out3 = 640, 32, 64
    x3 = jax.random.normal(keys[6], (N3, in3), jnp.float32)
    adj3 = make_adj(keys[7], N3)
    w3, b3 = init_gcn_params(keys[8], in3, out3, bias=True)

    o3 = graph_convolution(x3, adj3, w3, b3)
    jax.block_until_ready(o3)
    r3 = adj3 @ (x3 @ w3) + b3
    assert o3.shape == (N3, out3)
    assert jnp.allclose(o3, r3, atol=2e-4, rtol=2e-4)

    # two-pass fallback with a multi-block reduction (exercises _mm_acc_kernel)
    o3f = graph_convolution(x3, adj3, w3, b3, force_two_pass=True)
    jax.block_until_ready(o3f)
    assert jnp.allclose(o3f, r3, atol=2e-4, rtol=2e-4)

    print("KERNEL_OK")
</pallas_src>

<mosaic_0001>
module attributes {stable_mosaic.version = 11 : i64} {
  func.func @_gcn_fused_1k_kernel(%arg0: i32, %arg1: i32, %arg2: memref<128x128xf32, #tpu.memory_space<vmem>>, %arg3: memref<128x128xf32, #tpu.memory_space<vmem>>, %arg4: memref<128x128xf32, #tpu.memory_space<vmem>>, %arg5: memref<1x128xf32, #tpu.memory_space<vmem>>, %arg6: memref<128x128xf32, #tpu.memory_space<vmem>>) attributes {dimension_semantics = [#tpu.dimension_semantics<parallel>, #tpu.dimension_semantics<parallel>], iteration_bounds = array<i64: 1, 1>, scalar_prefetch = 0 : i64, scratch_operands = 0 : i64, tpu.core_type = #tpu.core_type<tc>, window_params = [{transform_indices = @transform_0, window_bounds = array<i64: 128, 128>}, {pipeline_mode = #tpu.pipeline_mode<synchronous>, transform_indices = @transform_1, window_bounds = array<i64: 128, 128>}, {transform_indices = @transform_2, window_bounds = array<i64: 128, 128>}, {transform_indices = @transform_3, window_bounds = array<i64: 1, 128>}, {transform_indices = @transform_4, window_bounds = array<i64: 128, 128>}]} {
    %c0 = arith.constant 0 : index
    %c0_0 = arith.constant 0 : index
    %0 = vector.load %arg2[%c0, %c0_0] : memref<128x128xf32, #tpu.memory_space<vmem>>, vector<128x128xf32>
    %c0_1 = arith.constant 0 : index
    %c0_2 = arith.constant 0 : index
    %1 = vector.load %arg3[%c0_1, %c0_2] : memref<128x128xf32, #tpu.memory_space<vmem>>, vector<128x128xf32>
    %c0_3 = arith.constant 0 : index
    %c0_4 = arith.constant 0 : index
    %2 = vector.load %arg4[%c0_3, %c0_4] : memref<128x128xf32, #tpu.memory_space<vmem>>, vector<128x128xf32>
    %cst = arith.constant dense<0.000000e+00> : vector<128x128xf32>
    %3 = tpu.matmul %1, %2, %cst {dimension_numbers = #tpu.dot_dimension_numbers<[1], [0], [0], [1], [0, 0, 1, 1], [], []>} : vector<128x128xf32>, vector<128x128xf32>, vector<128x128xf32> -> vector<128x128xf32>
    %cst_5 = arith.constant dense<0.000000e+00> : vector<128x128xf32>
    %4 = tpu.matmul %0, %3, %cst_5 {dimension_numbers = #tpu.dot_dimension_numbers<[1], [0], [0], [1], [0, 0, 1, 1], [], []>} : vector<128x128xf32>, vector<128x128xf32>, vector<128x128xf32> -> vector<128x128xf32>
    %c0_6 = arith.constant 0 : index
    %c0_7 = arith.constant 0 : index
    %5 = vector.load %arg5[%c0_6, %c0_7] : memref<1x128xf32, #tpu.memory_space<vmem>>, vector<1x128xf32>
    %6 = vector.broadcast %5 : vector<1x128xf32> to vector<128x128xf32>
    %7 = arith.addf %4, %6 : vector<128x128xf32>
    %c0_8 = arith.constant 0 : index
    %c0_9 = arith.constant 0 : index
    %8 = vector.load %arg6[%c0_8, %c0_9] : memref<128x128xf32, #tpu.memory_space<vmem>>, vector<128x128xf32>
    tpu.vector_store %arg6[%c0_8, %c0_9], %7 {strides = array<i32>} : memref<128x128xf32, #tpu.memory_space<vmem>>, vector<128x128xf32>,
    return
  }
  func.func @transform_0(%arg0: i32, %arg1: i32) -> (i32, i32) {
    %c0_i32 = arith.constant 0 : i32
    %c0_i32_0 = arith.constant 0 : i32
    return %arg0, %c0_i32 : i32, i32
  }
  func.func @transform_1(%arg0: i32, %arg1: i32) -> (i32, i32) {
    %c0_i32 = arith.constant 0 : i32
    %c0_i32_0 = arith.constant 0 : i32
    %c0_i32_1 = arith.constant 0 : i32
    return %c0_i32, %c0_i32_0 : i32, i32
  }
  func.func @transform_2(%arg0: i32, %arg1: i32) -> (i32, i32) {
    %c0_i32 = arith.constant 0 : i32
    %c0_i32_0 = arith.constant 0 : i32
    return %c0_i32, %arg1 : i32, i32
  }
  func.func @transform_3(%arg0: i32, %arg1: i32) -> (i32, i32) {
    %c0_i32 = arith.constant 0 : i32
    %c0_i32_0 = arith.constant 0 : i32
    return %c0_i32, %arg1 : i32, i32
  }
  func.func @transform_4(%arg0: i32, %arg1: i32) -> (i32, i32) {
    %c0_i32 = arith.constant 0 : i32
    return %arg0, %arg1 : i32, i32
  }
}

</mosaic_0001>

<bundles_post_ra>
// kernel: tpu_custom_call.1
= control target key start
LH: loop header
LB: loop body
LE: loop exit
PB: predicated region body
PF: predicated region fallthrough
CT: control target
= control target key end

     0   :  { %9 = vsyncpa [#allocation3], 0  ;;  %s880_s0 = inlined_call_operand.hbm [shape: f32[128,128], index: 0, kind: input, shape index: {}]   ;;  %s881_s1 = inlined_call_operand.hbm [shape: f32[128,128], index: 1, kind: input, shape index: {}]   ;;  %s882_s2 = inlined_call_operand.hbm [shape: f32[128,128], index: 2, kind: input, shape index: {}]   ;;  %s883_s3 = inlined_call_operand.vmem [shape: f32[1,128], index: 3, kind: input, shape index: {}]   ;;  %s884_s4 = inlined_call_operand.hbm [shape: f32[128,128], index: 4, kind: output, shape index: {}]  }
   0x1   :  { %10 = vsyncpa [#allocation6], 0 }
   0x2   :  { %11 = vsyncpa [#allocation4], 0  ;;  %s779_s15 = smov [#allocation5]   ;;  %s780_s17 = smov [#allocation2]  }
   0x3   :  { %s29_s16 = sshll.u32 %s779_s15, 4  ;;  %s17_s18 = sshll.u32 %s780_s17, 4  ;;  %s30_s16 = int_to_ptr.vmem [resolvable:$true] %s29_s16  ;;  %s810_s18 = int_to_ptr.vmem [resolvable:$true] %s17_s18 }
   0x4   :  { %s685_s21 = scalar_lea.hbm %s881_s1, 2048 }
   0x5   :  { %p686_p0 = scmp.ne.s32.totalorder %s881_s1, %s685_s21  ;;  %p689_p1 = scmp.lt.u32.totalorder %s685_s21, %s881_s1 }
   0x7   :  { %p691_p2 = pnand %p689_p1, %p686_p0 }
   0x9   :  { %694 = shalt.err (!%p691_p2)
}
   0xa   :  { %s695_s26 = scalar_lea.vmem %s30_s16, 2048  ;;  %p700_p4 = scmp.lt.s32.totalorder %s30_s16, %s30_s16 }
   0xb   :  { %p696_p3 = scmp.ne.s32.totalorder %s30_s16, %s695_s26  ;;  %p701_p5 = scmp.lt.s32.totalorder %s695_s26, %s695_s26 }
   0xd   :  { %p702_p6 = por %p701_p5, %p700_p4 }
   0xf   :  { %p703_p7 = pnand %p702_p6, %p696_p3 }
  0x11   :  { %706 = shalt.err (!%p703_p7)
}
  0x12   :  { %s781_s27 = smov 128   ;;  %s782_s28 = smov 8  }
  0x13   :  { %35 = dma.hbm_to_vmem [thread:$0]  %s881_s1, 2048, %s30_s16, [#allocation6], %s781_s27, %s781_s27, %s782_s28  }
  0x14   :  { %s707_s7 = scalar_lea.hbm %s880_s0, 2048 }
  0x15   :  { %p708_p8 = scmp.ne.s32.totalorder %s880_s0, %s707_s7  ;;  %p711_p9 = scmp.lt.u32.totalorder %s707_s7, %s880_s0 }
  0x17   :  { %p713_p10 = pnand %p711_p9, %p708_p8 }
  0x19   :  { %716 = shalt.err (!%p713_p10)
}
  0x1a   :  { %s717_s12 = scalar_lea.vmem %s810_s18, 2048  ;;  %p722_p12 = scmp.lt.s32.totalorder %s810_s18, %s810_s18 }
  0x1b   :  { %p718_p11 = scmp.ne.s32.totalorder %s810_s18, %s717_s12  ;;  %p723_p13 = scmp.lt.s32.totalorder %s717_s12, %s717_s12 }
  0x1d   :  { %p724_p0 = por %p723_p13, %p722_p12 }
  0x1f   :  { %p725_p1 = pnand %p724_p0, %p718_p11 }
  0x21   :  { %728 = shalt.err (!%p725_p1)
}
  0x22   :  { %23 = dma.hbm_to_vmem [thread:$0]  %s880_s0, 2048, %s810_s18, [#allocation3], %s781_s27, %s781_s27, %s782_s28  }
  0x23   :  { %s783_s14 = smov [#allocation7]   ;;  %s729_s19 = scalar_lea.hbm %s882_s2, 2048 }
  0x24   :  { %s41_s15 = sshll.u32 %s783_s14, 4  ;;  %p730_p2 = scmp.ne.s32.totalorder %s882_s2, %s729_s19  ;;  %s42_s15 = int_to_ptr.vmem [resolvable:$true] %s41_s15 }
  0x25   :  { %p733_p3 = scmp.lt.u32.totalorder %s729_s19, %s882_s2 }
  0x27   :  { %p735_p4 = pnand %p733_p3, %p730_p2 }
  0x29   :  { %738 = shalt.err (!%p735_p4)
}
  0x2a   :  { %s739_s24 = scalar_lea.vmem %s42_s15, 2048  ;;  %p744_p6 = scmp.lt.s32.totalorder %s42_s15, %s42_s15 }
  0x2b   :  { %p740_p5 = scmp.ne.s32.totalorder %s42_s15, %s739_s24  ;;  %p745_p7 = scmp.lt.s32.totalorder %s739_s24, %s739_s24 }
  0x2d   :  { %p746_p8 = por %p745_p7, %p744_p6 }
  0x2f   :  { %p747_p9 = pnand %p746_p8, %p740_p5 }
  0x31   :  { %750 = shalt.err (!%p747_p9)
}
  0x32   :  { %47 = dma.hbm_to_vmem [thread:$0]  %s882_s2, 2048, %s42_s15, [#allocation6], %s781_s27, %s781_s27, %s782_s28  }
  0x33   :  { %773 = dma.done.wait [#allocation3], 2048  }
  0x34   :  { %774 = vsyncadd [#allocation3], 4294965248 }
  0x35   :  { %775 = dma.done.wait [#allocation6], 4096  }
  0x36   :  { %776 = vsyncadd [#allocation6], 4294963200  ;;  %v91_v0 = vld [vmem:[#allocation7] sm:$0xff]  ;;  %v92_v1 = vld [vmem:[#allocation7 + $0x8] sm:$0xff] }
  0x37   :  { %v93_v2 = vld [vmem:[#allocation7 + $0x10] sm:$0xff]  ;;  %v615_v3 = vpack.c.bf16 %v92_v1, %v91_v0  ;;  %v94_v4 = vld [vmem:[#allocation7 + $0x18] sm:$0xff]  ;;  %v95_v6 = vld [vmem:[#allocation7 + $0x20] sm:$0xff] }
  0x38   :  { %v619_v5 = vpack.c.bf16 %v94_v4, %v93_v2  ;;  %v96_v7 = vld [vmem:[#allocation7 + $0x28] sm:$0xff]  ;;  %v75_v9 = vld [vmem:[#allocation5] sm:$0xff]  ;;  %v97_v10 = vld [vmem:[#allocation7 + $0x30] sm:$0xff] }
  0x39   :  { %616 = vmatprep.subr.bf16.mxu0 %v615_v3  ;;  %v623_v8 = vpack.c.bf16 %v96_v7, %v95_v6  ;;  %v98_v11 = vld [vmem:[#allocation7 + $0x38] sm:$0xff]  ;;  %535 = vmatprep.mubr.f32.mxu0 %v75_v9  ;;  %v99_v13 = vld [vmem:[#allocation7 + $0x40] sm:$0xff]  ;;  %v100_v14 = vld [vmem:[#allocation7 + $0x48] sm:$0xff] }
  0x3a   :  { %618 = vmatpush3.bf16.msra.mxu0 %v615_v3  ;;  %v627_v12 = vpack.c.bf16 %v98_v11, %v97_v10  ;;  %v631_v15 = vpack.c.bf16 %v100_v14, %v99_v13  ;;  %v101_v16 = vld [vmem:[#allocation7 + $0x50] sm:$0xff]  ;;  %v102_v17 = vld [vmem:[#allocation7 + $0x58] sm:$0xff]  ;;  %v103_v19 = vld [vmem:[#allocation7 + $0x60] sm:$0xff] }
  0x3b   :  { %620 = vmatprep.subr.bf16.mxu0 %v619_v5  ;;  %v635_v18 = vpack.c.bf16 %v102_v17, %v101_v16  ;;  %v104_v20 = vld [vmem:[#allocation7 + $0x68] sm:$0xff]  ;;  %v105_v22 = vld [vmem:[#allocation7 + $0x70] sm:$0xff]  ;;  %v106_v23 = vld [vmem:[#allocation7 + $0x78] sm:$0xff] }
  0x3c   :  { %v639_v21 = vpack.c.bf16 %v104_v20, %v103_v19  ;;  %v643_v24 = vpack.c.bf16 %v106_v23, %v105_v22  ;;  %v76_v25 = vld [vmem:[#allocation5 + $0x8] sm:$0xff]  ;;  %v77_v26 = vld [vmem:[#allocation5 + $0x10] sm:$0xff]  ;;  %v78_v27 = vld [vmem:[#allocation5 + $0x18] sm:$0xff] }
  0x3d   :  { %v79_v28 = vld [vmem:[#allocation5 + $0x20] sm:$0xff]  ;;  %v80_v29 = vld [vmem:[#allocation5 + $0x28] sm:$0xff]  ;;  %v81_v30 = vld [vmem:[#allocation5 + $0x30] sm:$0xff] }
  0x3e   :  { %622 = vmatpush3.bf16.msra.mxu0 %v619_v5  ;;  %v82_v31 = vld [vmem:[#allocation5 + $0x38] sm:$0xff]  ;;  %v83_v32 = vld [vmem:[#allocation5 + $0x40] sm:$0xff]  ;;  %v84_v33 = vld [vmem:[#allocation5 + $0x48] sm:$0xff] }
  0x3f   :  { %624 = vmatprep.subr.bf16.mxu0 %v623_v8  ;;  %v85_v34 = vld [vmem:[#allocation5 + $0x50] sm:$0xff]  ;;  %v86_v35 = vld [vmem:[#allocation5 + $0x58] sm:$0xff]  ;;  %v87_v36 = vld [vmem:[#allocation5 + $0x60] sm:$0xff] }
  0x40   :  { %v88_v37 = vld [vmem:[#allocation5 + $0x68] sm:$0xff]  ;;  %v89_v38 = vld [vmem:[#allocation5 + $0x70] sm:$0xff]  ;;  %v90_v39 = vld [vmem:[#allocation5 + $0x78] sm:$0xff] }
  0x41   :  { %v59_v40 = vld [vmem:[#allocation2] sm:$0xff]  ;;  %v60_v1 = vld [vmem:[#allocation2 + $0x8] sm:$0xff]  ;;  %v61_v2 = vld [vmem:[#allocation2 + $0x10] sm:$0xff] }
  0x42   :  { %626 = vmatpush3.bf16.msra.mxu0 %v623_v8  ;;  %591 = vmatprep.mubr.f32.mxu1 %v59_v40  ;;  %v62_v3 = vld [vmem:[#allocation2 + $0x18] sm:$0xff]  ;;  %v63_v4 = vld [vmem:[#allocation2 + $0x20] sm:$0xff]  ;;  %v64_v5 = vld [vmem:[#allocation2 + $0x28] sm:$0xff] }
  0x43   :  { %628 = vmatprep.subr.bf16.mxu0 %v627_v12  ;;  %v65_v6 = vld [vmem:[#allocation2 + $0x30] sm:$0xff]  ;;  %v66_v7 = vld [vmem:[#allocation2 + $0x38] sm:$0xff]  ;;  %v67_v8 = vld [vmem:[#allocation2 + $0x40] sm:$0xff] }
  0x44   :  { %v68_v9 = vld [vmem:[#allocation2 + $0x48] sm:$0xff]  ;;  %v69_v10 = vld [vmem:[#allocation2 + $0x50] sm:$0xff]  ;;  %v70_v11 = vld [vmem:[#allocation2 + $0x58] sm:$0xff] }
  0x45   :  { %v72_v13 = vld [vmem:[#allocation2 + $0x68] sm:$0xff]  ;;  %v73_v14 = vld [vmem:[#allocation2 + $0x70] sm:$0xff]  ;;  %v438_v16 = vld [vmem:[%s883_s3] ss:$0 sm:$0xff]  ;;  %s784_s3 = smov [#allocation8]  }
  0x46   :  { %630 = vmatpush3.bf16.msra.mxu0 %v627_v12  ;;  %v71_v12 = vld [vmem:[#allocation2 + $0x60] sm:$0xff]  ;;  %s425_s26 = sshll.u32 %s784_s3, 4  ;;  %s426_s26 = int_to_ptr.vmem [resolvable:$true] %s425_s26 }
  0x47   :  { %632 = vmatprep.subr.bf16.mxu0 %v631_v15  ;;  %s751_s29 = scalar_lea.vmem %s426_s26, 2048  ;;  %p756_p11 = scmp.lt.s32.totalorder %s426_s26, %s426_s26 }
  0x48   :  { %p752_p10 = scmp.ne.s32.totalorder %s426_s26, %s751_s29  ;;  %p757_p12 = scmp.lt.s32.totalorder %s751_s29, %s751_s29 }
  0x4a   :  { %634 = vmatpush3.bf16.msra.mxu0 %v631_v15  ;;  %v74_v15 = vld [vmem:[#allocation2 + $0x78] sm:$0xff]  ;;  %p758_p13 = por %p757_p12, %p756_p11 }
  0x4b   :  { %636 = vmatprep.subr.bf16.mxu0 %v635_v18 }
  0x4c   :  { %p759_p0 = pnand %p758_p13, %p752_p10 }
  0x4e   :  { %638 = vmatpush3.bf16.msra.mxu0 %v635_v18 }
  0x4f   :  { %640 = vmatprep.subr.bf16.mxu0 %v639_v21 }
  0x52   :  { %642 = vmatpush3.bf16.msra.mxu0 %v639_v21 }
  0x53   :  { %644 = vmatprep.subr.bf16.mxu0 %v643_v24 }
  0x56   :  { %646 = vmatpush3.bf16.msra.mxu0 %v643_v24 }
  0x59   :  { %536 = vmatmul.mubr.f32.vlgmr.msra.gmra.mrb[0].mxu0 %v76_v25 }
  0x5a   :  { %538 = vmatprep.mubr.f32.mxu0 %v77_v26 }
  0x5d   :  { %539 = vmatmul.mubr.f32.gmra.mrb[2].mxu0 %v78_v27 }
  0x5e   :  { %541 = vmatprep.mubr.f32.mxu0 %v79_v28 }
  0x61   :  { %542 = vmatmul.mubr.f32.gmra.mrb[4].mxu0 %v80_v29 }
  0x62   :  { %544 = vmatprep.mubr.f32.mxu0 %v81_v30 }
  0x65   :  { %545 = vmatmul.mubr.f32.gmra.mrb[6].mxu0 %v82_v31 }
  0x66   :  { %547 = vmatprep.mubr.f32.mxu0 %v83_v32 }
  0x69   :  { %548 = vmatmul.mubr.f32.gmra.mrb[8].mxu0 %v84_v33 }
  0x6a   :  { %550 = vmatprep.mubr.f32.mxu0 %v85_v34 }
  0x6d   :  { %551 = vmatmul.mubr.f32.gmra.mrb[10].mxu0 %v86_v35 }
  0x6e   :  { %553 = vmatprep.mubr.f32.mxu0 %v87_v36 }
  0x71   :  { %554 = vmatmul.mubr.f32.gmra.mrb[12].mxu0 %v88_v37 }
  0x72   :  { %556 = vmatprep.mubr.f32.mxu0 %v89_v38 }
  0x75   :  { %557 = vmatmul.mubr.f32.gmra.mrb[14].mxu0 %v90_v39 }
 0x12c   :  { %v537_v41 = vpop.f32.mrb[0].mxu0 }
 0x12d   :  { %v173_v42 = vpop.f32.mrb[1].mxu0 }
 0x12e   :  { %v647_v43 = vpack.c.bf16 %v537_v41, %v173_v42 }
 0x130   :  { %v540_v44 = vpop.f32.mrb[2].mxu0  ;;  %648 = vmatprep.subr.bf16.mxu1 %v647_v43 }
 0x131   :  { %v183_v45 = vpop.f32.mrb[3].mxu0  ;;  %650 = vmatpush3.bf16.msra.mxu1 %v647_v43 }
 0x132   :  { %v651_v46 = vpack.c.bf16 %v540_v44, %v183_v45 }
 0x134   :  { %v543_v47 = vpop.f32.mrb[4].mxu0  ;;  %652 = vmatprep.subr.bf16.mxu1 %v651_v46 }
 0x135   :  { %v193_v48 = vpop.f32.mrb[5].mxu0  ;;  %654 = vmatpush3.bf16.msra.mxu1 %v651_v46 }
 0x136   :  { %v655_v49 = vpack.c.bf16 %v543_v47, %v193_v48 }
 0x138   :  { %v546_v50 = vpop.f32.mrb[6].mxu0  ;;  %656 = vmatprep.subr.bf16.mxu1 %v655_v49 }
 0x139   :  { %v203_v51 = vpop.f32.mrb[7].mxu0  ;;  %658 = vmatpush3.bf16.msra.mxu1 %v655_v49 }
 0x13a   :  { %v659_v52 = vpack.c.bf16 %v546_v50, %v203_v51 }
 0x13c   :  { %v549_v53 = vpop.f32.mrb[8].mxu0  ;;  %660 = vmatprep.subr.bf16.mxu1 %v659_v52 }
 0x13d   :  { %v213_v54 = vpop.f32.mrb[9].mxu0  ;;  %662 = vmatpush3.bf16.msra.mxu1 %v659_v52 }
 0x13e   :  { %v663_v55 = vpack.c.bf16 %v549_v53, %v213_v54 }
 0x140   :  { %v552_v56 = vpop.f32.mrb[10].mxu0  ;;  %664 = vmatprep.subr.bf16.mxu1 %v663_v55 }
 0x141   :  { %v223_v57 = vpop.f32.mrb[11].mxu0  ;;  %666 = vmatpush3.bf16.msra.mxu1 %v663_v55 }
 0x142   :  { %v667_v58 = vpack.c.bf16 %v552_v56, %v223_v57 }
 0x144   :  { %v555_v59 = vpop.f32.mrb[12].mxu0  ;;  %668 = vmatprep.subr.bf16.mxu1 %v667_v58 }
 0x145   :  { %v233_v60 = vpop.f32.mrb[13].mxu0  ;;  %670 = vmatpush3.bf16.msra.mxu1 %v667_v58 }
 0x146   :  { %v671_v61 = vpack.c.bf16 %v555_v59, %v233_v60 }
 0x148   :  { %v558_v62 = vpop.f32.mrb[14].mxu0  ;;  %672 = vmatprep.subr.bf16.mxu1 %v671_v61 }
 0x149   :  { %v243_v63 = vpop.f32.mrb[15].mxu0  ;;  %674 = vmatpush3.bf16.msra.mxu1 %v671_v61 }
 0x14a   :  { %v675_v0 = vpack.c.bf16 %v558_v62, %v243_v63 }
 0x14c   :  { %676 = vmatprep.subr.bf16.mxu1 %v675_v0 }
 0x14d   :  { %678 = vmatpush3.bf16.msra.mxu1 %v675_v0 }
 0x150   :  { %592 = vmatmul.mubr.f32.vlgmr.msra.gmra.mrb[0].mxu1 %v60_v1 }
 0x151   :  { %594 = vmatprep.mubr.f32.mxu1 %v61_v2 }
 0x154   :  { %595 = vmatmul.mubr.f32.gmra.mrb[2].mxu1 %v62_v3 }
 0x155   :  { %597 = vmatprep.mubr.f32.mxu1 %v63_v4 }
 0x158   :  { %598 = vmatmul.mubr.f32.gmra.mrb[4].mxu1 %v64_v5 }
 0x159   :  { %600 = vmatprep.mubr.f32.mxu1 %v65_v6 }
 0x15c   :  { %601 = vmatmul.mubr.f32.gmra.mrb[6].mxu1 %v66_v7 }
 0x15d   :  { %603 = vmatprep.mubr.f32.mxu1 %v67_v8 }
 0x160   :  { %604 = vmatmul.mubr.f32.gmra.mrb[8].mxu1 %v68_v9 }
 0x161   :  { %606 = vmatprep.mubr.f32.mxu1 %v69_v10 }
 0x164   :  { %607 = vmatmul.mubr.f32.gmra.mrb[10].mxu1 %v70_v11 }
 0x165   :  { %609 = vmatprep.mubr.f32.mxu1 %v71_v12 }
 0x168   :  { %610 = vmatmul.mubr.f32.gmra.mrb[12].mxu1 %v72_v13 }
 0x169   :  { %612 = vmatprep.mubr.f32.mxu1 %v73_v14 }
 0x16c   :  { %613 = vmatmul.mubr.f32.gmra.mrb[14].mxu1 %v74_v15 }
 0x223   :  { %v593_v17 = vpop.f32.mrb[0].mxu1 }
 0x224   :  { %v331_v18 = vadd.f32 %v593_v17, %v438_v16  ;;  %v325_v19 = vpop.f32.mrb[1].mxu1 }
 0x225   :  { %v326_v20 = vadd.f32 %v438_v16, %v325_v19 }
 0x226   :  { %405 = vst [vmem:[#allocation8 + $0x8] sm:$0xff] %v331_v18 }
 0x227   :  { %404 = vst [vmem:[#allocation8] sm:$0xff] %v326_v20  ;;  %v596_v21 = vpop.f32.mrb[2].mxu1 }
 0x228   :  { %v341_v22 = vadd.f32 %v596_v21, %v438_v16  ;;  %v335_v23 = vpop.f32.mrb[3].mxu1 }
 0x229   :  { %v336_v24 = vadd.f32 %v438_v16, %v335_v23 }
 0x22a   :  { %407 = vst [vmem:[#allocation8 + $0x18] sm:$0xff] %v341_v22 }
 0x22b   :  { %406 = vst [vmem:[#allocation8 + $0x10] sm:$0xff] %v336_v24  ;;  %v599_v25 = vpop.f32.mrb[4].mxu1 }
 0x22c   :  { %v351_v26 = vadd.f32 %v599_v25, %v438_v16  ;;  %v345_v27 = vpop.f32.mrb[5].mxu1 }
 0x22d   :  { %v346_v28 = vadd.f32 %v438_v16, %v345_v27 }
 0x22e   :  { %409 = vst [vmem:[#allocation8 + $0x28] sm:$0xff] %v351_v26 }
 0x22f   :  { %408 = vst [vmem:[#allocation8 + $0x20] sm:$0xff] %v346_v28  ;;  %v602_v29 = vpop.f32.mrb[6].mxu1 }
 0x230   :  { %v361_v30 = vadd.f32 %v602_v29, %v438_v16  ;;  %v355_v31 = vpop.f32.mrb[7].mxu1 }
 0x231   :  { %v356_v32 = vadd.f32 %v438_v16, %v355_v31 }
 0x232   :  { %411 = vst [vmem:[#allocation8 + $0x38] sm:$0xff] %v361_v30 }
 0x233   :  { %410 = vst [vmem:[#allocation8 + $0x30] sm:$0xff] %v356_v32  ;;  %v605_v33 = vpop.f32.mrb[8].mxu1 }
 0x234   :  { %v371_v34 = vadd.f32 %v605_v33, %v438_v16  ;;  %v365_v35 = vpop.f32.mrb[9].mxu1 }
 0x235   :  { %v366_v36 = vadd.f32 %v438_v16, %v365_v35 }
 0x236   :  { %413 = vst [vmem:[#allocation8 + $0x48] sm:$0xff] %v371_v34 }
 0x237   :  { %412 = vst [vmem:[#allocation8 + $0x40] sm:$0xff] %v366_v36  ;;  %v608_v37 = vpop.f32.mrb[10].mxu1 }
 0x238   :  { %v381_v38 = vadd.f32 %v608_v37, %v438_v16  ;;  %v375_v39 = vpop.f32.mrb[11].mxu1 }
 0x239   :  { %v376_v40 = vadd.f32 %v438_v16, %v375_v39 }
 0x23a   :  { %415 = vst [vmem:[#allocation8 + $0x58] sm:$0xff] %v381_v38 }
 0x23b   :  { %414 = vst [vmem:[#allocation8 + $0x50] sm:$0xff] %v376_v40  ;;  %v611_v41 = vpop.f32.mrb[12].mxu1 }
 0x23c   :  { %v391_v42 = vadd.f32 %v611_v41, %v438_v16  ;;  %v385_v43 = vpop.f32.mrb[13].mxu1 }
 0x23d   :  { %v386_v44 = vadd.f32 %v438_v16, %v385_v43 }
 0x23e   :  { %417 = vst [vmem:[#allocation8 + $0x68] sm:$0xff] %v391_v42 }
 0x23f   :  { %416 = vst [vmem:[#allocation8 + $0x60] sm:$0xff] %v386_v44  ;;  %v614_v45 = vpop.f32.mrb[14].mxu1 }
 0x240   :  { %v401_v46 = vadd.f32 %v614_v45, %v438_v16  ;;  %v395_v47 = vpop.f32.mrb[15].mxu1 }
 0x241   :  { %v396_v48 = vadd.f32 %v438_v16, %v395_v47 }
 0x242   :  { %419 = vst [vmem:[#allocation8 + $0x78] sm:$0xff] %v401_v46 }
 0x243   :  { %418 = vst [vmem:[#allocation8 + $0x70] sm:$0xff] %v396_v48 }
 0x244   :  { %762 = shalt.err (!%p759_p0)
}
 0x245   :  { %s763_s6 = scalar_lea.hbm %s884_s4, 2048 }
 0x246   :  { %p764_p1 = scmp.ne.s32.totalorder %s884_s4, %s763_s6  ;;  %p767_p2 = scmp.lt.u32.totalorder %s763_s6, %s884_s4 }
 0x248   :  { %p769_p3 = pnand %p767_p2, %p764_p1 }
 0x24a   :  { %772 = shalt.err (!%p769_p3)
}
 0x24b   :  { %431 = dma.vmem_to_hbm [thread:$0]  %s426_s26, 2048, %s884_s4, [#allocation4], %s781_s27, %s781_s27, %s782_s28  }
 0x24c   :  { %777 = dma.done.wait [#allocation4], 2048  }
 0x24d   :  { %778 = vsyncadd [#allocation4], 4294965248 }
 0x24e   :  { %435 = vsyncpa [#allocation3], 1 }
 0x24f   :  { %436 = vsyncpa [#allocation6], 1 }
 0x250   :  { %437 = vsyncpa [#allocation4], 1 }

</bundles_post_ra>
